<compile_context>
chip_gen: v6e
topology: v6e:2x2x1
jax: 0.10.0
libtpu: 0.0.40
codegen_flags: <defaults>
</compile_context>

<pallas_src>
import jax
import jax.numpy as jnp
from jax.experimental import pallas as pl
from jax.experimental.pallas import tpu as pltpu


# ----------------------------------------------------------------------------
# Kernel body
# ----------------------------------------------------------------------------
def _hlap_kernel(sigma_ref, q_ref, qn_ref, kv_ref, kvn_ref, o_ref):
    # sigma_ref: SMEM (1,) scalar = exp(log_sigmas)
    # q_ref:  (bb, tm, D)   qn_ref:  (bb, tm, 1)
    # kv_ref: (bb, D, tn)   kvn_ref: (bb, 1, tn)
    # o_ref:  (bb, tm, tn)
    sigma = sigma_ref[0]
    bb = q_ref.shape[0]

    # Static unroll over the (small, <= 8) per-step batch fold; each iteration is
    # one 2-D MXU matmul plus a cheap VPU/EUP epilogue.
    for b in range(bb):
        q = q_ref[b]          # (tm, D)
        kv = kv_ref[b]        # (D, tn)
        q_norm = qn_ref[b]    # (tm, 1)  -- precomputed in the wrapper
        kv_norm = kvn_ref[b]  # (1, tn)  -- precomputed in the wrapper

        # Exact reciprocals of the small norm vectors: O(tm + tn) divides instead
        # of an O(tm*tn) per-element division in the epilogue.
        inv_q = 1.0 / q_norm
        inv_kv = 1.0 / kv_norm

        # MXU matmul, f32 accumulation.
        qkv = jnp.dot(q, kv, preferred_element_type=jnp.float32)   # (tm, tn)

        # Two sequential broadcast multiplies (no (tm,tn) inv outer-product temp).
        cos = (qkv * inv_q) * inv_kv
        # Clamp guards against fp rounding pushing cos slightly above 1 (-> NaN).
        r = jnp.sqrt(jnp.maximum(1.0 - cos, 0.0)) * sigma
        o_ref[b] = (q_norm * kv_norm) * jnp.exp(-r)


# ----------------------------------------------------------------------------
# Tiling / VMEM helpers
# ----------------------------------------------------------------------------
def _round_up(x, m):
    return ((x + m - 1) // m) * m


def _vmem_capacity_bytes():
    """Per-core VMEM capacity; conservative 64 MiB fallback (v7x) if unknown."""
    try:
        info = pltpu.get_tpu_info()
        cap = getattr(info, "vmem_capacity_bytes", None)
        if cap:
            return int(cap)
    except Exception:
        pass
    return 64 << 20


def _pick_tile(dim, cap, mult):
    """Pick (tile, padded_dim): tile % mult == 0, padded_dim % tile == 0,
    tile <= cap; prefers a divisor of the minimally-padded dim (no extra pad)."""
    cap = max(mult, cap - cap % mult)
    dp = _round_up(dim, mult)
    if dp <= cap:
        return dp, dp
    best = None
    for t in range(cap, mult - 1, -mult):
        if dp % t == 0:
            best = t
            break
    if best is not None and best >= max(mult, cap // 4):
        return best, dp              # good divisor -> zero extra padding
    return cap, _round_up(dim, cap)  # fall back to padding up to the cap


def _block_bytes(bb, tm, tn, d):
    """Double-buffered in/out blocks + epilogue temporary headroom (f32)."""
    blocks = bb * (tm * d + d * tn + tm * tn + tm + tn)
    return 2 * 4 * blocks + 4 * 4 * tm * tn


# ----------------------------------------------------------------------------
# Wrapper
# ----------------------------------------------------------------------------
def hlap_kernel_forward(Q, KV, log_sigmas):
    """Pallas implementation of HLapKernel.forward.

    Q:  (B, M, D) float32
    KV: (B, D, N) float32
    log_sigmas: (1,) float32 parameter (module init is torch.zeros(1))
    returns (B, M, N) float32
    """
    B, M, D = Q.shape
    B2, D2, N = KV.shape
    assert B == B2 and D == D2, "batch / inner dims must match"
    # NOTE: the torch module broadcasts exp(log_sigmas).view(1, 1, -1); with the
    # module's size-1 parameter this is a scalar, which is what we support here.
    assert log_sigmas.shape == (1,), "HLapKernel uses a single log_sigma"

    # ---- generation-aware tile selection ---------------------------------
    capacity = _vmem_capacity_bytes()
    budget = int(0.75 * capacity)               # leave scoped-VMEM headroom
    tm_cap = 512 if capacity >= (100 << 20) else 256   # bigger M tile on 128-MiB chips
    tn_cap = 512

    tm, Mp = _pick_tile(M, tm_cap, 8)       # sublane-aligned M tile
    tn, Np = _pick_tile(N, tn_cap, 128)     # lane-dense N tile (multiple of 128)

    # Shrink tiles until the double-buffered working set fits the VMEM budget.
    while _block_bytes(1, tm, tn, D) > budget:
        if tn > 128 and tn >= tm:
            tn, Np = _pick_tile(N, tn // 2, 128)
        elif tm > 8:
            tm, Mp = _pick_tile(M, tm // 2, 8)
        else:
            # TODO(synk): add a K/D reduction grid axis (accumulator + "arbitrary")
            # for very large D instead of relying on oversized whole-D blocks.
            break

    tiles_m = Mp // tm
    tiles_n = Np // tn

    # ---- batch folding (amortize ~0.35 us per-grid-step overhead) --------
    bb = 1
    if B > 1 and tiles_m * tiles_n <= 2:
        for cand in range(min(B, 8), 1, -1):
            if (B % cand == 0
                    and _block_bytes(cand, tm, tn, D) <= budget
                    and (B // cand) * tiles_m * tiles_n >= 2):  # keep >=2 steps (v7x 2 TCs)
                bb = cand
                break

    # ---- minimal padding (skipped entirely for aligned shapes) -----------
    Qp = Q if Mp == M else jnp.pad(Q, ((0, 0), (0, Mp - M), (0, 0)))
    KVp = KV if Np == N else jnp.pad(KV, ((0, 0), (0, 0), (0, Np - N)))

    # Norms hoisted out of the kernel (depend only on the M or N index; in-kernel
    # recompute would redo XLU reductions once per (i, j) tile).
    q_norm = jnp.sqrt(jnp.sum(Qp * Qp, axis=-1, keepdims=True))      # (B, Mp, 1)
    kv_norm = jnp.sqrt(jnp.sum(KVp * KVp, axis=-2, keepdims=True))   # (B, 1, Np)

    sigma = jnp.exp(log_sigmas).astype(jnp.float32)   # (1,) scalar in SMEM

    # ---- grid order: stream the operand whose re-reads cost fewer bytes --
    stream_q = (tiles_n * Mp * D) <= (tiles_m * D * Np)
    if stream_q:
        # KV tile held across the inner axis; Q re-streamed tiles_n times.
        grid = (B // bb, tiles_n, tiles_m)
        q_map = lambda b, j, i: (b, i, 0)
        kv_map = lambda b, j, i: (b, 0, j)
        o_map = lambda b, j, i: (b, i, j)
    else:
        # Q tile held; KV re-streamed tiles_m times.
        grid = (B // bb, tiles_m, tiles_n)
        q_map = lambda b, i, j: (b, i, 0)
        kv_map = lambda b, i, j: (b, 0, j)
        o_map = lambda b, i, j: (b, i, j)

    # ---- cost estimate (helps XLA overlap the custom call) ---------------
    itemsize = 4
    if stream_q:
        in_bytes = itemsize * (tiles_n * B * Mp * (D + 1) + B * (D + 1) * Np)
    else:
        in_bytes = itemsize * (B * Mp * (D + 1) + tiles_m * B * (D + 1) * Np)
    cost = pl.CostEstimate(
        flops=2 * B * Mp * Np * D + 6 * B * Mp * Np,
        transcendentals=2 * B * Mp * Np,              # sqrt + exp per output element
        bytes_accessed=in_bytes + itemsize * B * Mp * Np,
    )

    grid_spec = pltpu.PrefetchScalarGridSpec(
        num_scalar_prefetch=0,
        grid=grid,
        in_specs=[
            pl.BlockSpec(memory_space=pltpu.SMEM),    # sigma (1,)
            pl.BlockSpec((bb, tm, D), q_map),         # Q tile
            pl.BlockSpec((bb, tm, 1), q_map),         # q_norm tile
            pl.BlockSpec((bb, D, tn), kv_map),        # KV tile
            pl.BlockSpec((bb, 1, tn), kv_map),        # kv_norm tile
        ],
        out_specs=pl.BlockSpec((bb, tm, tn), o_map),
    )

    vmem_limit = max(32 << 20, _block_bytes(bb, tm, tn, D) + (8 << 20))
    vmem_limit = int(min(vmem_limit, capacity - (4 << 20)))

    out = pl.pallas_call(
        _hlap_kernel,
        out_shape=jax.ShapeDtypeStruct((B, Mp, Np), jnp.float32),
        grid_spec=grid_spec,
        compiler_params=pltpu.CompilerParams(
            dimension_semantics=("parallel", "parallel", "parallel"),
            vmem_limit_bytes=vmem_limit,
        ),
        cost_estimate=cost,
    )(sigma, Qp, q_norm, KVp, kv_norm)

    # Padded rows/cols (zero norms -> NaN there) are discarded here; only taken
    # when padding was actually applied.
    if Mp != M or Np != N:
        out = out[:, :M, :N]
    return out


# ----------------------------------------------------------------------------
# Pure-JAX reference (matches the PyTorch forward)
# ----------------------------------------------------------------------------
def _reference(Q, KV, log_sigmas):
    q_norm = jnp.sqrt(jnp.sum(Q * Q, axis=-1, keepdims=True))      # (B, M, 1)
    kv_norm = jnp.sqrt(jnp.sum(KV * KV, axis=-2, keepdims=True))   # (B, 1, N)
    qkv_norm = q_norm * kv_norm
    qkv = jnp.einsum("bmd,bdn->bmn", Q, KV)
    r = jnp.sqrt(1.0 - qkv / qkv_norm) * jnp.exp(log_sigmas).reshape(1, 1, -1)
    return qkv_norm * jnp.exp(-r)


if __name__ == "__main__":
    # Deterministic parameter init (module init: log_sigmas = zeros(1)).
    log_sigmas = jnp.zeros((1,), dtype=jnp.float32)

    # Small shapes: batch=2, seq M=16, hidden D=32, seq N=16.
    key = jax.random.PRNGKey(0)
    kq, kkv = jax.random.split(key)
    B, M, D, N = 2, 16, 32, 16
    Q = jax.random.normal(kq, (B, M, D), dtype=jnp.float32)
    KV = jax.random.normal(kkv, (B, D, N), dtype=jnp.float32)

    out = hlap_kernel_forward(Q, KV, log_sigmas)
    out = jax.block_until_ready(out)

    ref = jax.block_until_ready(_reference(Q, KV, log_sigmas))
    assert out.shape == (B, M, N)
    assert jnp.allclose(out, ref, atol=1e-5, rtol=1e-5), "mismatch vs reference"

    print("KERNEL_OK")
</pallas_src>

<mosaic_0001>
module attributes {stable_mosaic.version = 11 : i64} {
  func.func @_hlap_kernel(%arg0: i32, %arg1: i32, %arg2: i32, %arg3: memref<1xf32, #tpu.memory_space<smem>>, %arg4: memref<1x16x32xf32, #tpu.memory_space<vmem>>, %arg5: memref<1x16x1xf32, #tpu.memory_space<vmem>>, %arg6: memref<1x32x128xf32, #tpu.memory_space<vmem>>, %arg7: memref<1x1x128xf32, #tpu.memory_space<vmem>>, %arg8: memref<1x16x128xf32, #tpu.memory_space<vmem>>) attributes {dimension_semantics = [#tpu.dimension_semantics<parallel>, #tpu.dimension_semantics<parallel>, #tpu.dimension_semantics<parallel>], iteration_bounds = array<i64: 2, 1, 1>, scalar_prefetch = 0 : i64, scratch_operands = 0 : i64, tpu.core_type = #tpu.core_type<tc>, window_params = [{transform_indices = @transform_0, window_bounds = array<i64: 1>}, {transform_indices = @transform_1, window_bounds = array<i64: 1, 16, 32>}, {transform_indices = @transform_2, window_bounds = array<i64: 1, 16, 1>}, {transform_indices = @transform_3, window_bounds = array<i64: 1, 32, 128>}, {transform_indices = @transform_4, window_bounds = array<i64: 1, 1, 128>}, {transform_indices = @transform_5, window_bounds = array<i64: 1, 16, 128>}]} {
    %c0 = arith.constant 0 : index
    %0 = memref.load %arg3[%c0] : memref<1xf32, #tpu.memory_space<smem>>
    %c0_0 = arith.constant 0 : index
    %c0_1 = arith.constant 0 : index
    %c0_2 = arith.constant 0 : index
    %1 = vector.load %arg4[%c0_0, %c0_1, %c0_2] : memref<1x16x32xf32, #tpu.memory_space<vmem>>, vector<1x16x32xf32>
    %2 = vector.shape_cast %1 : vector<1x16x32xf32> to vector<16x32xf32>
    %c0_3 = arith.constant 0 : index
    %c0_4 = arith.constant 0 : index
    %c0_5 = arith.constant 0 : index
    %3 = vector.load %arg6[%c0_3, %c0_4, %c0_5] : memref<1x32x128xf32, #tpu.memory_space<vmem>>, vector<1x32x128xf32>
    %4 = vector.shape_cast %3 : vector<1x32x128xf32> to vector<32x128xf32>
    %c0_6 = arith.constant 0 : index
    %c0_7 = arith.constant 0 : index
    %c0_8 = arith.constant 0 : index
    %5 = vector.load %arg5[%c0_6, %c0_7, %c0_8] : memref<1x16x1xf32, #tpu.memory_space<vmem>>, vector<1x16x1xf32>
    %6 = vector.shape_cast %5 : vector<1x16x1xf32> to vector<16x1xf32>
    %c0_9 = arith.constant 0 : index
    %c0_10 = arith.constant 0 : index
    %c0_11 = arith.constant 0 : index
    %7 = vector.load %arg7[%c0_9, %c0_10, %c0_11] : memref<1x1x128xf32, #tpu.memory_space<vmem>>, vector<1x1x128xf32>
    %8 = vector.shape_cast %7 : vector<1x1x128xf32> to vector<1x128xf32>
    %cst = arith.constant 1.000000e+00 : f32
    %9 = vector.broadcast %cst : f32 to vector<16x1xf32>
    %10 = arith.divf %9, %6 : vector<16x1xf32>
    %cst_12 = arith.constant 1.000000e+00 : f32
    %11 = vector.broadcast %cst_12 : f32 to vector<1x128xf32>
    %12 = arith.divf %11, %8 : vector<1x128xf32>
    %cst_13 = arith.constant dense<0.000000e+00> : vector<16x128xf32>
    %13 = tpu.matmul %2, %4, %cst_13 {dimension_numbers = #tpu.dot_dimension_numbers<[1], [0], [0], [1], [0, 0, 1, 1], [], []>} : vector<16x32xf32>, vector<32x128xf32>, vector<16x128xf32> -> vector<16x128xf32>
    %14 = vector.broadcast %10 : vector<16x1xf32> to vector<16x128xf32>
    %15 = arith.mulf %13, %14 : vector<16x128xf32>
    %16 = vector.broadcast %12 : vector<1x128xf32> to vector<16x128xf32>
    %17 = arith.mulf %15, %16 : vector<16x128xf32>
    %cst_14 = arith.constant 1.000000e+00 : f32
    %18 = vector.broadcast %cst_14 : f32 to vector<16x128xf32>
    %19 = arith.subf %18, %17 : vector<16x128xf32>
    %cst_15 = arith.constant 0.000000e+00 : f32
    %20 = vector.broadcast %cst_15 : f32 to vector<16x128xf32>
    %21 = arith.maximumf %19, %20 : vector<16x128xf32>
    %22 = math.sqrt %21 : vector<16x128xf32>
    %23 = vector.broadcast %0 : f32 to vector<16x128xf32>
    %24 = arith.mulf %22, %23 : vector<16x128xf32>
    %25 = vector.broadcast %6 : vector<16x1xf32> to vector<16x128xf32>
    %26 = vector.broadcast %8 : vector<1x128xf32> to vector<16x128xf32>
    %27 = arith.mulf %25, %26 : vector<16x128xf32>
    %cst_16 = arith.constant 0.000000e+00 : f32
    %28 = vector.broadcast %cst_16 : f32 to vector<16x128xf32>
    %29 = arith.subf %28, %24 : vector<16x128xf32>
    %30 = math.exp %29 : vector<16x128xf32>
    %31 = arith.mulf %27, %30 : vector<16x128xf32>
    %c0_17 = arith.constant 0 : index
    %c0_18 = arith.constant 0 : index
    %c0_19 = arith.constant 0 : index
    %32 = vector.load %arg8[%c0_17, %c0_18, %c0_19] : memref<1x16x128xf32, #tpu.memory_space<vmem>>, vector<1x16x128xf32>
    %33 = vector.shape_cast %32 : vector<1x16x128xf32> to vector<16x128xf32>
    %34 = vector.shape_cast %31 : vector<16x128xf32> to vector<1x16x128xf32>
    tpu.vector_store %arg8[%c0_17, %c0_18, %c0_19], %34 {strides = array<i32>} : memref<1x16x128xf32, #tpu.memory_space<vmem>>, vector<1x16x128xf32>,
    return
  }
  func.func @transform_0(%arg0: i32, %arg1: i32, %arg2: i32) -> i32 {
    %c0_i32 = arith.constant 0 : i32
    %c0_i32_0 = arith.constant 0 : i32
    return %c0_i32 : i32
  }
  func.func @transform_1(%arg0: i32, %arg1: i32, %arg2: i32) -> (i32, i32, i32) {
    %c0_i32 = arith.constant 0 : i32
    %c0_i32_0 = arith.constant 0 : i32
    return %arg0, %arg2, %c0_i32 : i32, i32, i32
  }
  func.func @transform_2(%arg0: i32, %arg1: i32, %arg2: i32) -> (i32, i32, i32) {
    %c0_i32 = arith.constant 0 : i32
    %c0_i32_0 = arith.constant 0 : i32
    return %arg0, %arg2, %c0_i32 : i32, i32, i32
  }
  func.func @transform_3(%arg0: i32, %arg1: i32, %arg2: i32) -> (i32, i32, i32) {
    %c0_i32 = arith.constant 0 : i32
    %c0_i32_0 = arith.constant 0 : i32
    return %arg0, %c0_i32, %arg1 : i32, i32, i32
  }
  func.func @transform_4(%arg0: i32, %arg1: i32, %arg2: i32) -> (i32, i32, i32) {
    %c0_i32 = arith.constant 0 : i32
    %c0_i32_0 = arith.constant 0 : i32
    return %arg0, %c0_i32, %arg1 : i32, i32, i32
  }
  func.func @transform_5(%arg0: i32, %arg1: i32, %arg2: i32) -> (i32, i32, i32) {
    %c0_i32 = arith.constant 0 : i32
    return %arg0, %arg2, %arg1 : i32, i32, i32
  }
}

</mosaic_0001>

<bundles_post_ra>
// kernel: tpu_custom_call.1
= control target key start
LH: loop header
LB: loop body
LE: loop exit
PB: predicated region body
PF: predicated region fallthrough
CT: control target
= control target key end

     0   :  { %s1129_s0 = inlined_call_operand.<no memory space> [shape: f32[1], index: 0, kind: input, shape index: {}]   ;;  %s1130_s1 = inlined_call_operand.vmem [shape: f32[2,16,32], index: 1, kind: input, shape index: {}]   ;;  %s1131_s2 = inlined_call_operand.vmem [shape: f32[2,16,1], index: 2, kind: input, shape index: {}]   ;;  %s1132_s3 = inlined_call_operand.hbm [shape: f32[2,32,128], index: 3, kind: input, shape index: {}]   ;;  %s1133_s4 = inlined_call_operand.vmem [shape: f32[2,1,128], index: 4, kind: input, shape index: {}]   ;;  %s1134_s5 = inlined_call_operand.hbm [shape: f32[2,16,128], index: 5, kind: output, shape index: {}]  }
   0x1   :  { %10 = sst [smem:[#allocation2]] %s1129_s0 }
   0x2   :  { %11 = vsyncpa [#allocation4], 0 }
   0x3   :  { %13 = vsyncpa [#allocation4 + $0x1], 0 }
   0x4   :  { %14 = vsyncpa [#allocation5], 0 }
   0x5   :  { %16 = vsyncpa [#allocation5 + $0x1], 0  ;;  %s965_s20 = smov 0   ;;  %s967_s21 = smov 0  }
   0x6   :  { %s969_s22 = smov 0   ;;  %s971_s23 = smov 0  }
   0x7   :  { %s973_s24 = smov 0   ;;  %s975_s25 = smov 0  }
   0x8 LB: > { %s690_s0 = sadd.s32 4294967295, %s923_s25   ;;  %s691_s26 = sadd.s32 4294967294, %s923_s25   ;;  %s923_s25 = sphi %s975_s25, %s22_s25   ;;  %s919_s24 = sphi %s973_s24, %s1145_s24   ;;  %s915_s23 = sphi %s971_s23, %s1144_s23   ;;  %s911_s22 = sphi %s969_s22, %s1143_s22   ;;  %s907_s21 = sphi %s967_s21, %s1142_s21   ;;  %s903_s20 = sphi %s965_s20, %s1141_s20  }
   0x9   : > { %s41_s27 = sadd.s32 1, %s919_s24  ;;  %s127_s28 = sadd.s32 1, %s911_s22 }
   0xa   : > { %p43_p0 = scmp.ge.s32.totalorder %s41_s27, 2  ;;  %p134_p1 = scmp.ne.s32.totalorder %s911_s22, %s907_s21 }
   0xb   : > { %p135_p2 = scmp.eq.s32.totalorder %s923_s25, 0  ;;  %p140_p3 = scmp.ne.s32.totalorder %s907_s21, %s903_s20 }
   0xc   : > { %s1147_s27 = smov (%p43_p0, %s41_s27), 0  ;;  %p141_p5 = scmp.eq.s32.totalorder %s690_s0, 0 }
   0xd   : > { %p1006_p4 = por %p135_p2, %p134_p1  ;;  %s122_s30 = ssub.s32 %s919_s24, %s1147_s27 }
   0xe   : > { %p196_p6 = scmp.eq.s32.totalorder %s690_s0, 1  ;;  %p125_p7 = scmp.eq.s32.totalorder %s122_s30, 0 }
   0xf   : > { %p1012_p8 = por %p141_p5, %p140_p3  ;;  %p202_p10 = scmp.eq.s32.totalorder %s691_s26, 1 }
  0x10   : > { %p1016_p9 = por %p196_p6, %p134_p1  ;;  %p744_p13 = scmp.lt.s32.totalorder %s923_s25, 2 }
  0x11   : > { %s1021_s8 = scalar_select %p125_p7, %s911_s22, %s127_s28  }
  0x12   : > { %p1023_p11 = por %p202_p10, %p140_p3  ;;  %s251_s10 = sand.u32 1, %s911_s22  }
  0x13   : > { %s694_s11 = sshll.u32 %s251_s10, 5  ;;  %s711_s12 = sshll.u32 %s919_s24, 9 }
  0x14   : > { %s262_s15 = scalar_lea.hbm %s1132_s3, %s711_s12  ;;  %s255_s16 = scalar_lea.vmem [#allocation3], %s694_s11 }
  0x15   : > { %s263_s17 = sshll.u32 %s255_s16, 4  ;;  %p1036_p0 = pnand %p744_p13, %p1006_p4  ;;  %s264_s17 = int_to_ptr.vmem [resolvable:$true] %s263_s17 }
  0x16   : > { %p697_p1 = scmp.ge.s32.totalorder %s923_s25, 1  ;;  %s252_s19 = scalar_lea.sflag [#allocation4], %s251_s10 }
  0x17   : > { %p817_p2 = pneg %p1036_p0  ;;  %s828_s0 = scalar_lea.vmem %s264_s17, 512 }
  0x18   : > { %p829_p3 = scmp.ne.s32.totalorder %s264_s17, %s828_s0  ;;  %s925_s26 = smov [#allocation3]  }
  0x19   : > { %s833_s28 = sshll.u32 %s925_s26, 4  ;;  %s834_s28 = int_to_ptr.vmem [resolvable:$false] %s833_s28 }
  0x1a   : > { %p831_p5 = pnand %p829_p3, %p817_p2  ;;  %s835_s30 = scalar_lea.vmem %s834_s28, 1024 }
  0x1b   : > { %p836_p7 = scmp.lt.s32.totalorder %s264_s17, %s834_s28  ;;  %p837_p10 = scmp.lt.s32.totalorder %s835_s30, %s828_s0 }
  0x1c   : > { %p832_p6 = pneg %p831_p5 }
  0x1d   : > { %p838_p12 = por %p837_p10, %p836_p7 }
  0x1f   : > { %p839_p4 = pnand %p838_p12, %p832_p6 }
  0x21   : > { %842 = shalt.err (!%p839_p4)
}
  0x22   : > { %s926_s29 = smov 128   ;;  %s927_s10 = smov 8  }
  0x23   : > { %739 = dma.hbm_to_vmem [thread:$0]  (!%p1036_p0), %s262_s15, 512, %s264_s17, %s252_s19, %s926_s29, %s926_s29, %s927_s10  }
  0x24   : > { %p280_p13 = scmp.lt.s32.totalorder %s923_s25, 3 }
  0x26   : > { %p281_p2 = pnand %p697_p1, %p280_p13 }
  0x27   : > { %s1049_s11 = sand.u32 (!%p281_p2), 1, %s907_s21  }
  0x28   : > { %284 = sbr.rel (%p281_p2) target bundleno = 313 (0x139), region = 40  ;;  %s698_s12 = sshll.u32 (!%p281_p2), %s1049_s11, 5 }
  0x29   : > { %s287_s13 = scalar_lea.sflag (!%p281_p2), [#allocation4], %s1049_s11  ;;  %s290_s14 = scalar_lea.vmem (!%p281_p2), [#allocation3], %s698_s12 }
  0x2d   : > { %894 = dma.done.wait (%p1012_p8), %s287_s13, 512  }
  0x2e   : > { %896 = vsyncadd (%p1012_p8), %s287_s13, 4294966784  ;;  %p342_p12 = scmp.lt.s32.totalorder %s915_s23, 1  ;;  %v928_v0 = vmov 0   ;;  %vm384_vm0 = vcmask 261120   ;;  %v374_v1 = vld [vmem:[%s290_s14 + $0x18] sm:$0xff]  ;;  %v373_v2 = vld [vmem:[%s290_s14 + $0x10] sm:$0xff]  ;;  %v479_v12 = vlaneseq }
  0x2f   : > { %799 = vset.pattern.permute.xlu0 %v928_v0  ;;  %800 = vset.pattern.permute.xlu1 %v928_v0  ;;  %v372_v4 = vld [vmem:[%s290_s14 + $0x8] sm:$0xff]  ;;  %v371_v7 = vld [vmem:[%s290_s14] sm:$0xff]  ;;  %s368_s10 = sld [smem:[#allocation2]]  ;;  %s699_s12 = sshll.u32 %s1049_s11, 4 }
  0x30   : > { %s1059_s15 = scalar_select %p342_p12, %s915_s23, 1  ;;  %721 = vmatprep.subr.mxu0 %v374_v1  ;;  %v480_v13 = vshrl.u32 %v479_v12, 7 }
  0x31   : > { %722 = vmatpush3.msra.mxu0 %v374_v1  ;;  %s340_s13 = scalar_lea.vmem [#allocation6], %s699_s12 }
  0x32   : > { %s712_s16 = sshll.u32 %s1059_s15, 4  ;;  %723 = vmatprep.subr.mxu0 %v373_v2  ;;  %s366_s29 = scalar_lea.vmem %s1133_s4, %s1059_s15  ;;  %v481_v15 = vsub.s32 0, %v480_v13 }
  0x33   : > { %s349_s19 = scalar_lea.vmem %s1130_s1, %s712_s16  ;;  %s359_s28 = scalar_lea.vmem %s1131_s2, %s712_s16  ;;  %724 = vmatpush3.msra.mxu0 %v373_v2  ;;  %v377_v11 = vld [vmem:[%s366_s29] sm:$0x1] }
  0x34   : > { %v369_v3 = vld [vmem:[%s349_s19] sm:$0xff]  ;;  %v376_v6 = vld [vmem:[%s359_s28 + $0x8] sm:$0xff]  ;;  %725 = vmatprep.subr.mxu0 %v372_v4  ;;  %v521_v47 = vrot.slane %v377_v11, %v481_v15  ;;  %s552_s14 = sshll.u32 %s340_s13, 4  ;;  %s714_s15 = sshll.u32 %s915_s23, 8  ;;  %s1076_s14 = int_to_ptr.vmem [resolvable:$true] %s552_s14 }
  0x35   : > { %v375_v5 = vld [vmem:[%s359_s28] sm:$0xff]  ;;  %729 = vmatprep.mubr.msk.f32.mxu0 %vm384_vm0, %v369_v3  ;;  %726 = vmatpush3.msra.mxu0 %v372_v4  ;;  %v370_v8 = vld [vmem:[%s349_s19 + $0x8] sm:$0xff]  ;;  %v504_v33 = vstv %s368_s10  ;;  %s1081_s18 = scalar_lea.hbm %s1134_s5, %s714_s15  ;;  %s536_s19 = scalar_lea.sflag [#allocation5], %s1049_s11 }
  0x36   : > { %801 = vrcp.f32 %v375_v5  ;;  %509 = vperm.xlu1 %800, %v375_v5   ;;  %727 = vmatprep.subr.mxu0 %v371_v7  ;;  %s843_s0 = scalar_lea.vmem %s1076_s14, 256  ;;  %s929_s23 = smov [#allocation6]  }
  0x37   : > { %803 = vrcp.f32 %v376_v6  ;;  %728 = vmatpush3.msra.mxu0 %v371_v7  ;;  %p844_p8 = scmp.ne.s32.totalorder %s1076_s14, %s843_s0  ;;  %s847_s26 = sshll.u32 %s929_s23, 4  ;;  %s848_s26 = int_to_ptr.vmem [resolvable:$false] %s847_s26 }
  0x38   : > { %730 = vmatmul.mubr.msk.f32.vlgmr.msra.gmra.mxu0 %vm384_vm0, %v370_v8  ;;  %805 = vrcp.f32 %v377_v11  ;;  %s849_s28 = scalar_lea.vmem %s848_s26, 512  ;;  %p850_p3 = scmp.lt.s32.totalorder %s1076_s14, %s848_s26 }
  0x39   : > { %p845_p0 = pnand %p844_p8, %p1016_p9  ;;  %p851_p5 = scmp.lt.s32.totalorder %s849_s28, %s843_s0 }
  0x3a   : > { %514 = vperm.xlu1 %800, %v376_v6  }
  0x3b   : > { %p846_p1 = pneg %p845_p0  ;;  %p852_p6 = por %p851_p5, %p850_p3 }
  0x3d   : > { %p853_p7 = pnand %p852_p6, %p846_p1 }
  0x43   : > { %v802_v9 = vpop.eup %801 }
  0x44   : > { %468 = vperm.xlu0 %799, %v802_v9   ;;  %v804_v10 = vpop.eup %803 }
  0x45   : > { %v806_v16 = vpop.eup %805 }
  0x46   : > { %v482_v17 = vrot.slane %v806_v16, %v481_v15 }
  0x48   : > { %473 = vperm.xlu0 %799, %v804_v10  }
  0xb1   : > { %v510_v46 = vpop.permute.xlu1 %509 }
  0xb2   : > { %v523_v51 = vmul.f32 %v521_v47, %v510_v46 }
  0xb5   : > { %v515_v48 = vpop.permute.xlu1 %514 }
  0xb6   : > { %v524_v49 = vmul.f32 %v521_v47, %v515_v48 }
  0xbf   : > { %v469_v14 = vpop.permute.xlu0 %468 }
  0xc3   : > { %v474_v18 = vpop.permute.xlu0 %473 }
  0xf8   : > { %v731_v19 = vpop.f32.mrf.mxu0 }
  0xf9   : > { %v477_v20 = vmul.f32 %v731_v19, %v474_v18 }
  0xfa   : > { %v457_v21 = vpop.f32.mrf.mxu0 }
  0xfb   : > { %v485_v22 = vmul.f32 %v482_v17, %v477_v20  ;;  %v476_v23 = vmul.f32 %v469_v14, %v457_v21 }
  0xfd   : > { %v487_v24 = vsub.f32 1.0, %v485_v22  ;;  %v484_v25 = vmul.f32 %v482_v17, %v476_v23 }
  0xff   : > { %v489_v26 = vmax.f32 %v487_v24, 0.0  ;;  %v486_v27 = vsub.f32 1.0, %v484_v25 }
 0x101   : > { %807 = vrsqrt.f32 %v489_v26  ;;  %v488_v28 = vmax.f32 %v486_v27, 0.0  ;;  %vm499_vm1 = vcmp.eq.f32.partialorder %v489_v26, inf  ;;  %v502_v32 = vand.u32 2147483648, %v489_v26 }
 0x102   : > { %vm501_vm2 = vcmp.eq.f32.partialorder %v489_v26, 0.0 }
 0x103   : > { %809 = vrsqrt.f32 %v488_v28  ;;  %vm492_vm3 = vcmp.eq.f32.partialorder %v488_v28, inf  ;;  %v495_v36 = vand.u32 2147483648, %v488_v28  ;;  %vm494_vm4 = vcmp.eq.f32.partialorder %v488_v28, 0.0 }
 0x10e   : > { %v808_v29 = vpop.eup %807 }
 0x10f   : > { %v498_v30 = vmul.f32 %v808_v29, %v489_v26 }
 0x110   : > { %v810_v31 = vpop.eup %809 }
 0x111   : > { %v491_v34 = vmul.f32 %v810_v31, %v488_v28  ;;  %v500_v35 = vsel %vm499_vm1, %v489_v26, %v498_v30 }
 0x112   : > { %v503_v37 = vsel %vm501_vm2, %v502_v32, %v500_v35 }
 0x113   : > { %v493_v38 = vsel %vm492_vm3, %v488_v28, %v491_v34  ;;  %v506_v39 = vmul.f32 %v504_v33, %v503_v37 }
 0x114   : > { %v496_v40 = vsel %vm494_vm4, %v495_v36, %v493_v38 }
 0x115   : > { %v505_v41 = vmul.f32 %v504_v33, %v496_v40  ;;  %v526_v42 = vsub.f32 0.0, %v506_v39 }
 0x117   : > { %v525_v43 = vsub.f32 0.0, %v505_v41  ;;  %v529_v44 = vmul.f32 1.442695, %v526_v42 }
 0x119   : > { %v527_v45 = vmul.f32 1.442695, %v525_v43  ;;  %811 = vpow2.f32 %v529_v44 }
 0x11b   : > { %813 = vpow2.f32 %v527_v45 }
 0x126   : > { %v812_v50 = vpop.eup %811 }
 0x127   : > { %v532_v52 = vmul.f32 %v812_v50, %v524_v49 }
 0x128   : > { %v814_v53 = vpop.eup %813 }
 0x129   : > { %v531_v54 = vmul.f32 %v814_v53, %v523_v51  ;;  %534 = vst [vmem:[%s340_s13 + $0x8] sm:$0xff] %v532_v52 }
 0x12b   : > { %533 = vst [vmem:[%s340_s13] sm:$0xff] %v531_v54 }
 0x12c   : > { %856 = shalt.err (!%p853_p7)
}
 0x12d   : > { %s857_s6 = scalar_lea.hbm %s1081_s18, 256  ;;  %s861_s10 = scalar_lea.hbm %s1134_s5, 512 }
 0x12e   : > { %p858_p10 = scmp.ne.s32.totalorder %s1081_s18, %s857_s6  ;;  %p862_p2 = scmp.lt.s32.totalorder %s1081_s18, %s1134_s5 }
 0x12f   : > { %p863_p12 = scmp.lt.s32.totalorder %s861_s10, %s857_s6 }
 0x130   : > { %p859_p4 = pnand %p858_p10, %p1016_p9 }
 0x131   : > { %p864_p8 = por %p863_p12, %p862_p2 }
 0x132   : > { %p860_p13 = pneg %p859_p4 }
 0x134   : > { %p865_p0 = pnand %p864_p8, %p860_p13 }
 0x136   : > { %868 = shalt.err (!%p865_p0)
}
 0x137   : > { %s930_s15 = smov 128   ;;  %s931_s16 = smov 8  }
 0x138   : > { %734 = dma.vmem_to_hbm [thread:$0]  (%p1016_p9), %s1076_s14, 256, %s1081_s18, %s536_s19, %s930_s15, %s930_s15, %s931_s16  }
 0x139 PF: > { %s567_s17 = sand.u32 1, %s903_s20   ;;  %p1140_p1 = scmp.ge.s32.totalorder %s923_s25, 2 }
 0x13a   : > { %s568_s0 = scalar_lea.sflag [#allocation5], %s567_s17 }
 0x13b   : > { %p741_p3 = pnand %p1140_p1, %p1023_p11 }
 0x13d   : > { %p742_p5 = pneg %p741_p3 }
 0x13f   : > { %898 = dma.done.wait (%p742_p5), %s568_s0, 256  }
 0x140   : > { %900 = vsyncadd (%p742_p5), %s568_s0, 4294967040  ;;  %s22_s25 = sadd.s32 1, %s923_s25   ;;  %s1141_s20 = smov %s907_s21 }
 0x141   : > { %p19_p6 = scmp.ge.s32.totalorder %s22_s25, 4   ;;  %s1142_s21 = smov %s911_s22 }
 0x142   : > { %s1143_s22 = smov %s1021_s8  ;;  %s1144_s23 = smov %s919_s24 }
 0x143   : > { %s1145_s24 = smov %s1147_s27  ;;  %21 = sbr.rel (!%p19_p6) target bundleno = 8 (0x8), region = 94 }
 0x148   :  { %573 = vsyncpa [#allocation4], 1 }
 0x149   :  { %575 = vsyncpa [#allocation4 + $0x1], 1 }
 0x14a   :  { %576 = vsyncpa [#allocation5], 1 }
 0x14b   :  { %578 = vsyncpa [#allocation5 + $0x1], 1 }

</bundles_post_ra>
